<compile_context>
chip_gen: v7x
topology: tpu7x:2x2x1
jax: 0.10.0
libtpu: 0.0.40
codegen_flags: <defaults>
</compile_context>

<pallas_src>
import functools
import math

import jax
import jax.numpy as jnp
from jax.experimental import pallas as pl
from jax.experimental.pallas import tpu as pltpu

_LANE = 128
_SUBLANE = 8


def _round_up(x, m):
    return ((x + m - 1) // m) * m


def _vmem_capacity_bytes():
    """Generation-aware VMEM capacity (64 MiB v7x, 128 MiB v5e/v6e)."""
    try:
        cap = int(getattr(pltpu.get_tpu_info(), "vmem_capacity_bytes", 0))
        if cap > 0:
            return cap
    except Exception:
        pass
    return 64 << 20  # conservative fallback (v7x per-TC)


# ----------------------------- kernel ----------------------------------------


def _head_kernel(x_ref, w_ref, b_ref, o_ref, *, act_func):
    # x_ref: (tm, dim_in)   w_ref: (dim_in, n_pad)   b_ref: (1, n_pad) f32
    x = x_ref[...]
    w = w_ref[...]
    if x.dtype != w.dtype:
        x = x.astype(w.dtype)  # bf16 weights -> bf16 MXU inputs, f32 accumulation
    logits = jnp.dot(x, w, preferred_element_type=jnp.float32)
    logits = logits + b_ref[...]  # f32 bias; padded class columns carry -1e30
    if act_func == "softmax":
        m = jnp.max(logits, axis=-1, keepdims=True)
        e = jnp.exp(logits - m)
        denom = jnp.sum(e, axis=-1, keepdims=True)
        out = e / denom  # exact divide: rows sum to 1; VPU/EUP nowhere near saturated
    else:  # "sigmoid"
        out = jax.nn.sigmoid(logits)
    o_ref[...] = out.astype(o_ref.dtype)


# ----------------------------- wrapper ----------------------------------------


def prepare_head_params(weight, bias, *, weight_dtype=jnp.bfloat16):
    """Hoist weight transpose + class-axis lane padding out of the call path.

    weight: (num_classes, dim_in), bias: (num_classes,)
    returns (w_t (dim_in, n_pad) in weight_dtype, bias (1, n_pad) f32).
    Padded class columns get bias = -1e30 so softmax gives them ~0 probability
    (sigmoid maps them to 0); they are sliced off after the kernel.
    """
    num_classes, dim_in = weight.shape
    n_pad = _round_up(num_classes, _LANE)
    w_t = jnp.zeros((dim_in, n_pad), dtype=weight_dtype)
    w_t = w_t.at[:, :num_classes].set(weight.T.astype(weight_dtype))
    b = jnp.full((1, n_pad), -1e30, dtype=jnp.float32)
    b = b.at[0, :num_classes].set(bias.astype(jnp.float32))
    return w_t, b


def classification_basic_head(x, w_t, b_pad, num_classes, *,
                              act_func="softmax", max_tm=None,
                              return_padded=False):
    """x: (B, T, dim_in); w_t: (dim_in, n_pad); b_pad: (1, n_pad) from prepare_head_params."""
    if act_func not in ("softmax", "sigmoid"):
        raise NotImplementedError(
            f"{act_func} is not supported as an activation function.")

    B, T, dim_in = x.shape
    assert w_t.shape[0] == dim_in
    n_pad = w_t.shape[1]
    assert n_pad % _LANE == 0 and num_classes <= n_pad
    M = B * T
    x2 = x.reshape(M, dim_in)

    x_itemsize = jnp.dtype(x.dtype).itemsize
    w_itemsize = jnp.dtype(w_t.dtype).itemsize
    sub = 16 if x.dtype == jnp.bfloat16 else _SUBLANE

    vmem_cap = _vmem_capacity_bytes()
    budget = int(vmem_cap * 0.75)             # ~48 MiB on v7x, ~96 MiB on v5e/v6e
    if max_tm is None:
        max_tm = 1024 if vmem_cap >= (96 << 20) else 512

    def _vmem_bytes(t):
        # double-buffered x tile + out tile; weight + bias single-buffered
        # (Buffered(1), constant index_map -> DMA'd once).
        return (2 * t * dim_in * x_itemsize
                + 2 * t * n_pad * x_itemsize
                + 1 * dim_in * n_pad * w_itemsize
                + 1 * n_pad * 4)

    # Row-tile selection.
    if M <= max_tm:
        tm = _round_up(M, sub)
        # Keep both v7x TensorCores busy on mid-sized batches (>=2 parallel steps).
        if M >= 256:
            tm = _round_up(pl.cdiv(M, 2), sub)
    else:
        tm = _round_up(max_tm, sub)
    while tm > sub and _vmem_bytes(tm) > budget:
        tm //= 2
    tm = max(_round_up(tm, sub), sub)
    # TODO(synk): for weights too large even single-buffered in bf16 (> budget),
    # add a K-reduction grid axis with an f32 (tm, n_pad) accumulator scratch.

    grid_m = pl.cdiv(M, tm)

    need = _vmem_bytes(tm)
    vmem_limit = None
    if need > (12 << 20):
        vmem_limit = int(min(2 * need, int(vmem_cap * 0.8)))

    cost = pl.CostEstimate(
        flops=2 * M * dim_in * n_pad,
        transcendentals=M * n_pad,
        bytes_accessed=(M * dim_in * x_itemsize
                        + dim_in * n_pad * w_itemsize
                        + n_pad * 4
                        + M * n_pad * x_itemsize),
    )

    kernel = functools.partial(_head_kernel, act_func=act_func)

    def _run(use_buffered):
        def const_spec(shape):
            if use_buffered:
                return pl.BlockSpec(shape, lambda i: (0, 0),
                                    pipeline_mode=pl.Buffered(1))
            return pl.BlockSpec(shape, lambda i: (0, 0))

        return pl.pallas_call(
            kernel,
            out_shape=jax.ShapeDtypeStruct((M, n_pad), x.dtype),
            grid_spec=pltpu.PrefetchScalarGridSpec(
                num_scalar_prefetch=0,
                grid=(grid_m,),
                in_specs=[
                    pl.BlockSpec((tm, dim_in), lambda i: (i, 0)),
                    const_spec((dim_in, n_pad)),
                    const_spec((1, n_pad)),
                ],
                out_specs=pl.BlockSpec((tm, n_pad), lambda i: (i, 0)),
            ),
            compiler_params=pltpu.CompilerParams(
                dimension_semantics=("parallel",),
                vmem_limit_bytes=vmem_limit,
            ),
            cost_estimate=cost,
        )(x2, w_t, b_pad)

    try:
        out2 = _run(use_buffered=True)
    except Exception:
        # Fallback if this JAX build rejects Buffered(1) on constant blocks.
        out2 = _run(use_buffered=False)

    if return_padded:
        # Padded class columns are exactly 0 probability; consumers doing
        # argmax/top-k can skip the (non-lane-multiple) slice copy entirely.
        return out2.reshape(B, T, n_pad)
    return out2[:, :num_classes].reshape(B, T, num_classes)


def classification_basic_head_from_linear(x, weight, bias, *, act_func="softmax"):
    """Convenience path: accepts raw nn.Linear-style (num_classes, dim_in) weight."""
    w_t, b_pad = prepare_head_params(weight, bias)
    return classification_basic_head(x, w_t, b_pad, weight.shape[0],
                                     act_func=act_func)


def init_linear_params(key, dim_in, num_classes, dtype=jnp.float32):
    """Deterministic init matching nn.Linear's default (kaiming-uniform-ish)."""
    kw, kb = jax.random.split(key)
    bound = 1.0 / math.sqrt(dim_in)
    weight = jax.random.uniform(kw, (num_classes, dim_in), dtype,
                                minval=-bound, maxval=bound)
    bias = jax.random.uniform(kb, (num_classes,), dtype,
                              minval=-bound, maxval=bound)
    return weight, bias


if __name__ == "__main__":
    # dropout_rate = 0.0 and eval mode => dropout is identity (not instantiated).
    # TODO(synk): training-mode dropout (stateful RNG masking) not implemented.
    # TODO(synk): CHUNKS == False (softmax over dim=1) variant not wired up.
    B, T, dim_in, num_classes = 2, 8, 32, 16

    key = jax.random.PRNGKey(0)
    kx, kp = jax.random.split(key)
    x = jax.random.normal(kx, (B, T, dim_in), dtype=jnp.float32)
    weight, bias = init_linear_params(kp, dim_in, num_classes)

    # Hoisted once (the per-step call only touches x and the prepared params).
    w_t, b_pad = prepare_head_params(weight, bias)   # bf16 weights, f32 bias

    out = classification_basic_head(x, w_t, b_pad, num_classes)
    out = jax.block_until_ready(out)
    assert out.shape == (B, T, num_classes)

    # Tight check against a reference using the same bf16-rounded operands
    # (validates the kernel's math independent of the precision choice).
    ref_bf16 = jax.nn.softmax(
        x.astype(jnp.bfloat16).astype(jnp.float32)
        @ weight.T.astype(jnp.bfloat16).astype(jnp.float32)
        + bias, axis=-1)
    assert jnp.allclose(out, ref_bf16, atol=2e-3, rtol=2e-3)

    # Looser sanity check against the full-f32 PyTorch-equivalent reference
    # (bf16 weight storage perturbs logits by O(1e-2) at most here).
    ref_f32 = jax.nn.softmax(x @ weight.T + bias, axis=-1)
    assert jnp.allclose(out, ref_f32, atol=3e-2, rtol=3e-2)

    # Softmax rows sum to 1 (exact divide in the kernel).
    assert jnp.allclose(jnp.sum(out, axis=-1), 1.0, atol=1e-3)

    print("KERNEL_OK")
</pallas_src>

<mosaic_0001>
module attributes {stable_mosaic.version = 11 : i64} {
  func.func @_head_kernel(%arg0: i32, %arg1: memref<16x32xf32, #tpu.memory_space<vmem>>, %arg2: memref<32x128xbf16, #tpu.memory_space<vmem>>, %arg3: memref<1x128xf32, #tpu.memory_space<vmem>>, %arg4: memref<16x128xf32, #tpu.memory_space<vmem>>) attributes {dimension_semantics = [#tpu.dimension_semantics<parallel>], iteration_bounds = array<i64: 1>, scalar_prefetch = 0 : i64, scratch_operands = 0 : i64, tpu.core_type = #tpu.core_type<tc>, window_params = [{transform_indices = @transform_0, window_bounds = array<i64: 16, 32>}, {pipeline_mode = #tpu.pipeline_mode<synchronous>, transform_indices = @transform_1, window_bounds = array<i64: 32, 128>}, {pipeline_mode = #tpu.pipeline_mode<synchronous>, transform_indices = @transform_2, window_bounds = array<i64: 1, 128>}, {transform_indices = @transform_3, window_bounds = array<i64: 16, 128>}]} {
    %c0 = arith.constant 0 : index
    %c0_0 = arith.constant 0 : index
    %0 = vector.load %arg1[%c0, %c0_0] : memref<16x32xf32, #tpu.memory_space<vmem>>, vector<16x32xf32>
    %c0_1 = arith.constant 0 : index
    %c0_2 = arith.constant 0 : index
    %1 = vector.load %arg2[%c0_1, %c0_2] : memref<32x128xbf16, #tpu.memory_space<vmem>>, vector<32x128xbf16>
    %2 = arith.truncf %0 : vector<16x32xf32> to vector<16x32xbf16>
    %cst = arith.constant dense<0.000000e+00> : vector<16x128xf32>
    %3 = tpu.matmul %2, %1, %cst {dimension_numbers = #tpu.dot_dimension_numbers<[1], [0], [0], [1], [0, 0, 1, 1], [], []>} : vector<16x32xbf16>, vector<32x128xbf16>, vector<16x128xf32> -> vector<16x128xf32>
    %c0_3 = arith.constant 0 : index
    %c0_4 = arith.constant 0 : index
    %4 = vector.load %arg3[%c0_3, %c0_4] : memref<1x128xf32, #tpu.memory_space<vmem>>, vector<1x128xf32>
    %5 = vector.broadcast %4 : vector<1x128xf32> to vector<16x128xf32>
    %6 = arith.addf %3, %5 : vector<16x128xf32>
    %cst_5 = arith.constant dense<0xFF800000> : vector<16xf32>
    %7 = vector.multi_reduction <maximumf>, %6, %cst_5 [1] : vector<16x128xf32> to vector<16xf32>
    %8 = vector.shape_cast %7 : vector<16xf32> to vector<16x1xf32>
    %9 = vector.broadcast %8 : vector<16x1xf32> to vector<16x128xf32>
    %10 = arith.subf %6, %9 : vector<16x128xf32>
    %11 = math.exp %10 : vector<16x128xf32>
    %cst_6 = arith.constant dense<0.000000e+00> : vector<16xf32>
    %12 = vector.multi_reduction <add>, %11, %cst_6 [1] : vector<16x128xf32> to vector<16xf32>
    %13 = vector.shape_cast %12 : vector<16xf32> to vector<16x1xf32>
    %14 = vector.broadcast %13 : vector<16x1xf32> to vector<16x128xf32>
    %15 = arith.divf %11, %14 : vector<16x128xf32>
    %c0_7 = arith.constant 0 : index
    %c0_8 = arith.constant 0 : index
    %16 = vector.load %arg4[%c0_7, %c0_8] : memref<16x128xf32, #tpu.memory_space<vmem>>, vector<16x128xf32>
    tpu.vector_store %arg4[%c0_7, %c0_8], %15 {strides = array<i32>} : memref<16x128xf32, #tpu.memory_space<vmem>>, vector<16x128xf32>,
    return
  }
  func.func @transform_0(%arg0: i32) -> (i32, i32) {
    %c0_i32 = arith.constant 0 : i32
    %c0_i32_0 = arith.constant 0 : i32
    return %arg0, %c0_i32 : i32, i32
  }
  func.func @transform_1(%arg0: i32) -> (i32, i32) {
    %c0_i32 = arith.constant 0 : i32
    %c0_i32_0 = arith.constant 0 : i32
    %c0_i32_1 = arith.constant 0 : i32
    return %c0_i32, %c0_i32_0 : i32, i32
  }
  func.func @transform_2(%arg0: i32) -> (i32, i32) {
    %c0_i32 = arith.constant 0 : i32
    %c0_i32_0 = arith.constant 0 : i32
    %c0_i32_1 = arith.constant 0 : i32
    return %c0_i32, %c0_i32_0 : i32, i32
  }
  func.func @transform_3(%arg0: i32) -> (i32, i32) {
    %c0_i32 = arith.constant 0 : i32
    %c0_i32_0 = arith.constant 0 : i32
    return %arg0, %c0_i32 : i32, i32
  }
}

module attributes {stable_mosaic.version = 11 : i64} {
  func.func @_head_kernel(%arg0: i32, %arg1: memref<16x32xf32, #tpu.memory_space<vmem>>, %arg2: memref<32x128xbf16, #tpu.memory_space<vmem>>, %arg3: memref<1x128xf32, #tpu.memory_space<vmem>>, %arg4: memref<16x128xf32, #tpu.memory_space<vmem>>) attributes {dimension_semantics = [#tpu.dimension_semantics<parallel>], iteration_bounds = array<i64: 1>, scalar_prefetch = 0 : i64, scratch_operands = 0 : i64, tpu.core_type = #tpu.core_type<tc>, window_params = [{transform_indices = @transform_0, window_bounds = array<i64: 16, 32>}, {pipeline_mode = #tpu.pipeline_mode<synchronous>, transform_indices = @transform_1, window_bounds = array<i64: 32, 128>}, {pipeline_mode = #tpu.pipeline_mode<synchronous>, transform_indices = @transform_2, window_bounds = array<i64: 1, 128>}, {transform_indices = @transform_3, window_bounds = array<i64: 16, 128>}]} {
    %c0 = arith.constant 0 : index
    %c0_0 = arith.constant 0 : index
    %0 = vector.load %arg1[%c0, %c0_0] : memref<16x32xf32, #tpu.memory_space<vmem>>, vector<16x32xf32>
    %c0_1 = arith.constant 0 : index
    %c0_2 = arith.constant 0 : index
    %1 = vector.load %arg2[%c0_1, %c0_2] : memref<32x128xbf16, #tpu.memory_space<vmem>>, vector<32x128xbf16>
    %2 = arith.truncf %0 : vector<16x32xf32> to vector<16x32xbf16>
    %cst = arith.constant dense<0.000000e+00> : vector<16x128xf32>
    %3 = tpu.matmul %2, %1, %cst {dimension_numbers = #tpu.dot_dimension_numbers<[1], [0], [0], [1], [0, 0, 1, 1], [], []>} : vector<16x32xbf16>, vector<32x128xbf16>, vector<16x128xf32> -> vector<16x128xf32>
    %c0_3 = arith.constant 0 : index
    %c0_4 = arith.constant 0 : index
    %4 = vector.load %arg3[%c0_3, %c0_4] : memref<1x128xf32, #tpu.memory_space<vmem>>, vector<1x128xf32>
    %5 = vector.broadcast %4 : vector<1x128xf32> to vector<16x128xf32>
    %6 = arith.addf %3, %5 : vector<16x128xf32>
    %cst_5 = arith.constant dense<0xFF800000> : vector<16xf32>
    %7 = vector.multi_reduction <maximumf>, %6, %cst_5 [1] : vector<16x128xf32> to vector<16xf32>
    %8 = vector.shape_cast %7 : vector<16xf32> to vector<16x1xf32>
    %9 = vector.broadcast %8 : vector<16x1xf32> to vector<16x128xf32>
    %10 = arith.subf %6, %9 : vector<16x128xf32>
    %11 = math.exp %10 : vector<16x128xf32>
    %cst_6 = arith.constant dense<0.000000e+00> : vector<16xf32>
    %12 = vector.multi_reduction <add>, %11, %cst_6 [1] : vector<16x128xf32> to vector<16xf32>
    %13 = vector.shape_cast %12 : vector<16xf32> to vector<16x1xf32>
    %14 = vector.broadcast %13 : vector<16x1xf32> to vector<16x128xf32>
    %15 = arith.divf %11, %14 : vector<16x128xf32>
    %c0_7 = arith.constant 0 : index
    %c0_8 = arith.constant 0 : index
    %16 = vector.load %arg4[%c0_7, %c0_8] : memref<16x128xf32, #tpu.memory_space<vmem>>, vector<16x128xf32>
    tpu.vector_store %arg4[%c0_7, %c0_8], %15 {strides = array<i32>} : memref<16x128xf32, #tpu.memory_space<vmem>>, vector<16x128xf32>,
    return
  }
  func.func @transform_0(%arg0: i32) -> (i32, i32) {
    %c0_i32 = arith.constant 0 : i32
    %c0_i32_0 = arith.constant 0 : i32
    return %arg0, %c0_i32 : i32, i32
  }
  func.func @transform_1(%arg0: i32) -> (i32, i32) {
    %c0_i32 = arith.constant 0 : i32
    %c0_i32_0 = arith.constant 0 : i32
    %c0_i32_1 = arith.constant 0 : i32
    return %c0_i32, %c0_i32_0 : i32, i32
  }
  func.func @transform_2(%arg0: i32) -> (i32, i32) {
    %c0_i32 = arith.constant 0 : i32
    %c0_i32_0 = arith.constant 0 : i32
    %c0_i32_1 = arith.constant 0 : i32
    return %c0_i32, %c0_i32_0 : i32, i32
  }
  func.func @transform_3(%arg0: i32) -> (i32, i32) {
    %c0_i32 = arith.constant 0 : i32
    %c0_i32_0 = arith.constant 0 : i32
    return %arg0, %c0_i32 : i32, i32
  }
}

</mosaic_0001>

<bundles_post_ra>
// kernel: tpu_custom_call.1
= control target key start
LH: loop header
LB: loop body
LE: loop exit
PB: predicated region body
PF: predicated region fallthrough
CT: control target
= control target key end

     0   :  { %8 = vsyncpa [#allocation3], 0  ;;  %s333_s0 = inlined_call_operand.hbm [shape: f32[16,32], index: 0, kind: input, shape index: {}]   ;;  %s334_s1 = inlined_call_operand.hbm [shape: bf16[32,128], index: 1, kind: input, shape index: {}]   ;;  %s335_s2 = inlined_call_operand.vmem [shape: f32[1,128], index: 2, kind: input, shape index: {}]   ;;  %s336_s3 = inlined_call_operand.hbm [shape: f32[16,128], index: 3, kind: output, shape index: {}]  }
   0x1   :  { %9 = vsyncpa [#allocation6], 0 }
   0x2   :  { %10 = vsyncpa [#allocation4], 0  ;;  %s259_s12 = smov [#allocation2]   ;;  %s187_s16 = scalar_lea.hbm %s333_s0, 256 }
   0x3   :  { %s16_s13 = sshll.u32 %s259_s12, 4  ;;  %p188_p0 = scmp.ne.s32.totalorder %s333_s0, %s187_s16  ;;  %s17_s13 = int_to_ptr.vmem [resolvable:$true] %s16_s13 }
   0x4   :  { %p191_p1 = scmp.lt.u32.totalorder %s187_s16, %s333_s0 }
   0x6   :  { %p193_p2 = pnand %p191_p1, %p188_p0 }
   0x8   :  { %196 = shalt.err (!%p193_p2)
}
   0x9   :  { %s197_s21 = scalar_lea.vmem %s17_s13, 256  ;;  %p202_p4 = scmp.lt.s32.totalorder %s17_s13, %s17_s13 }
   0xa   :  { %p198_p3 = scmp.ne.s32.totalorder %s17_s13, %s197_s21  ;;  %p203_p5 = scmp.lt.s32.totalorder %s197_s21, %s197_s21 }
   0xc   :  { %p204_p6 = por %p203_p5, %p202_p4 }
   0xe   :  { %p205_p7 = pnand %p204_p6, %p198_p3 }
  0x10   :  { %208 = shalt.err (!%p205_p7)
}
  0x11   :  { %s260_s22 = smov 128   ;;  %s261_s23 = smov 8  }
  0x12   :  { %22 = dma.hbm_to_vmem [thread:$0]  %s333_s0, 256, %s17_s13, [#allocation3], %s260_s22, %s260_s22, %s261_s23  }
  0x13   :  { %s262_s26 = smov [#allocation5]   ;;  %s209_s30 = scalar_lea.hbm %s334_s1, 256 }
  0x14   :  { %s28_s27 = sshll.u32 %s262_s26, 4  ;;  %p210_p8 = scmp.ne.s32.totalorder %s334_s1, %s209_s30  ;;  %s29_s27 = int_to_ptr.vmem [resolvable:$true] %s28_s27 }
  0x15   :  { %p213_p9 = scmp.lt.u32.totalorder %s209_s30, %s334_s1 }
  0x17   :  { %p215_p10 = pnand %p213_p9, %p210_p8 }
  0x19   :  { %218 = shalt.err (!%p215_p10)
}
  0x1a   :  { %s219_s8 = scalar_lea.vmem %s29_s27, 256  ;;  %p224_p12 = scmp.lt.s32.totalorder %s29_s27, %s29_s27 }
  0x1b   :  { %p220_p11 = scmp.ne.s32.totalorder %s29_s27, %s219_s8  ;;  %p225_p13 = scmp.lt.s32.totalorder %s219_s8, %s219_s8 }
  0x1d   :  { %p226_p0 = por %p225_p13, %p224_p12 }
  0x1f   :  { %p227_p1 = pnand %p226_p0, %p220_p11 }
  0x21   :  { %230 = shalt.err (!%p227_p1)
}
  0x22   :  { %s263_s0 = smov 64   ;;  %s264_s9 = smov 4  }
  0x23   :  { %34 = dma.hbm_to_vmem [thread:$0]  %s334_s1, 256, %s29_s27, [#allocation6], %s263_s0, %s263_s0, %s264_s9  }
  0x24   :  { %253 = dma.done.wait [#allocation3], 256  }
  0x25   :  { %254 = vsyncadd [#allocation3], 4294967040 }
  0x26   :  { %255 = dma.done.wait [#allocation6], 256  }
  0x27   :  { %256 = vsyncadd [#allocation6], 4294967040  ;;  %v265_v0 = vmov 0.0   ;;  %vm266_vm0 = vmmov 0   ;;  %v177_v1 = vld [vmem:[#allocation5] sm:$0xff]   ;;  %v178_v2 = vld [vmem:[#allocation5 + $0x8] sm:$0xff]  }
  0x28   :  { %160 = vmatprep.subr.bf16.mxu0 %v265_v0  ;;  %164 = vmatprep.mubr.msk.bf16.mxu0 %vm266_vm0, %v265_v0  ;;  %v44_v3 = vld [vmem:[#allocation2] sm:$0xff]  ;;  %v45_v4 = vld [vmem:[#allocation2 + $0x8] sm:$0xff]  ;;  %vm70_vm1 = vcmask 261120  }
  0x29   :  { %161 = vmatpush3.bf16.msra.mxu0 %v177_v1  ;;  %v50_v5 = vpack.c.bf16 %v45_v4, %v44_v3  ;;  %v153_v6 = vld [vmem:[%s335_s2] ss:$0 sm:$0xff]  ;;  %s267_s2 = smov [#allocation7]  }
  0x2a   :  { %162 = vmatprep.subr.bf16.mxu0 %v265_v0  ;;  %s140_s13 = sshll.u32 %s267_s2, 4  ;;  %s141_s13 = int_to_ptr.vmem [resolvable:$true] %s140_s13 }
  0x2b   :  { %s231_s14 = scalar_lea.vmem %s141_s13, 256  ;;  %p236_p3 = scmp.lt.s32.totalorder %s141_s13, %s141_s13 }
  0x2c   :  { %p232_p2 = scmp.ne.s32.totalorder %s141_s13, %s231_s14  ;;  %p237_p4 = scmp.lt.s32.totalorder %s231_s14, %s231_s14 }
  0x2d   :  { %163 = vmatpush3.bf16.msra.mxu0 %v178_v2 }
  0x2e   :  { %p238_p5 = por %p237_p4, %p236_p3 }
  0x30   :  { %165 = vmatmul.mubr.msk.bf16.vlgmr.msra.gmra.mrb[0].mxu0 %vm70_vm1, %v50_v5  ;;  %p239_p6 = pnand %p238_p5, %p232_p2 }
 0x103   :  { %v108_v7 = vpop.f32.mrb[0].mxu0 }
 0x104   :  { %v109_v8 = vadd.f32 %v153_v6, %v108_v7  ;;  %v166_v9 = vpop.f32.mrb[1].mxu0 }
 0x105   :  { %v111_v10 = vpop.f32.mrb[2].mxu0 }
 0x106   :  { %115 = vmax.xlane.f32.xlu0 %v109_v8  ;;  %v167_v11 = vpop.f32.mrb[3].mxu0  ;;  %v112_v12 = vadd.f32 %v153_v6, %v111_v10 }
 0x10a   :  { %117 = vmax.xlane.f32.xlu0 %v112_v12 }
 0x193   :  { %v116_v13 = vpop.xlane.xlu0 %115 }
 0x194   :  { %v119_v14 = vsub.f32 %v109_v8, %v116_v13 }
 0x196   :  { %v121_v15 = vmul.f32 1.442695, %v119_v14 }
 0x197   :  { %v118_v16 = vpop.xlane.xlu0 %117 }
 0x198   :  { %179 = vpow2.f32 %v121_v15  ;;  %v120_v17 = vsub.f32 %v112_v12, %v118_v16 }
 0x19a   :  { %v123_v18 = vmul.f32 1.442695, %v120_v17 }
 0x19c   :  { %181 = vpow2.f32 %v123_v18 }
 0x1a2   :  { %v180_v19 = vpop.eup %179 }
 0x1a3   :  { %125 = vadd.xlane.f32.xlu1 %v180_v19 }
 0x1a6   :  { %v182_v20 = vpop.eup %181 }
 0x1a7   :  { %127 = vadd.xlane.f32.xlu1 %v182_v20 }
 0x230   :  { %v126_v21 = vpop.xlane.xlu1 %125 }
 0x231   :  { %183 = vrcp.f32 %v126_v21 }
 0x234   :  { %v128_v22 = vpop.xlane.xlu1 %127 }
 0x235   :  { %185 = vrcp.f32 %v128_v22 }
 0x23b   :  { %v184_v23 = vpop.eup %183 }
 0x23c   :  { %v130_v24 = vmul.f32 %v184_v23, %v180_v19 }
 0x23e   :  { %133 = vst [vmem:[#allocation7] sm:$0xff] %v130_v24 }
 0x23f   :  { %v186_v25 = vpop.eup %185 }
 0x240   :  { %v132_v26 = vmul.f32 %v186_v25, %v182_v20 }
 0x242   :  { %134 = vst [vmem:[#allocation7 + $0x8] sm:$0xff] %v132_v26 }
 0x243   :  { %242 = shalt.err (!%p239_p6)
}
 0x244   :  { %s243_s17 = scalar_lea.hbm %s336_s3, 256 }
 0x245   :  { %p244_p7 = scmp.ne.s32.totalorder %s336_s3, %s243_s17  ;;  %p247_p8 = scmp.lt.u32.totalorder %s243_s17, %s336_s3 }
 0x247   :  { %p249_p9 = pnand %p247_p8, %p244_p7 }
 0x249   :  { %252 = shalt.err (!%p249_p9)
}
 0x24a   :  { %146 = dma.vmem_to_hbm [thread:$0]  %s141_s13, 256, %s336_s3, [#allocation4], %s260_s22, %s260_s22, %s261_s23  }
 0x24b   :  { %257 = dma.done.wait [#allocation4], 256  }
 0x24c   :  { %258 = vsyncadd [#allocation4], 4294967040 }
 0x24d   :  { %150 = vsyncpa [#allocation3], 1 }
 0x24e   :  { %151 = vsyncpa [#allocation6], 1 }
 0x24f   :  { %152 = vsyncpa [#allocation4], 1 }

// kernel: tpu_custom_call.1
= control target key start
LH: loop header
LB: loop body
LE: loop exit
PB: predicated region body
PF: predicated region fallthrough
CT: control target
= control target key end

     0   :  { %8 = vsyncpa [#allocation3], 0  ;;  %s333_s0 = inlined_call_operand.hbm [shape: f32[16,32], index: 0, kind: input, shape index: {}]   ;;  %s334_s1 = inlined_call_operand.hbm [shape: bf16[32,128], index: 1, kind: input, shape index: {}]   ;;  %s335_s2 = inlined_call_operand.vmem [shape: f32[1,128], index: 2, kind: input, shape index: {}]   ;;  %s336_s3 = inlined_call_operand.hbm [shape: f32[16,128], index: 3, kind: output, shape index: {}]  }
   0x1   :  { %9 = vsyncpa [#allocation6], 0 }
   0x2   :  { %10 = vsyncpa [#allocation4], 0  ;;  %s259_s12 = smov [#allocation2]   ;;  %s187_s16 = scalar_lea.hbm %s333_s0, 256 }
   0x3   :  { %s16_s13 = sshll.u32 %s259_s12, 4  ;;  %p188_p0 = scmp.ne.s32.totalorder %s333_s0, %s187_s16  ;;  %s17_s13 = int_to_ptr.vmem [resolvable:$true] %s16_s13 }
   0x4   :  { %p191_p1 = scmp.lt.u32.totalorder %s187_s16, %s333_s0 }
   0x6   :  { %p193_p2 = pnand %p191_p1, %p188_p0 }
   0x8   :  { %196 = shalt.err (!%p193_p2)
}
   0x9   :  { %s197_s21 = scalar_lea.vmem %s17_s13, 256  ;;  %p202_p4 = scmp.lt.s32.totalorder %s17_s13, %s17_s13 }
   0xa   :  { %p198_p3 = scmp.ne.s32.totalorder %s17_s13, %s197_s21  ;;  %p203_p5 = scmp.lt.s32.totalorder %s197_s21, %s197_s21 }
   0xc   :  { %p204_p6 = por %p203_p5, %p202_p4 }
   0xe   :  { %p205_p7 = pnand %p204_p6, %p198_p3 }
  0x10   :  { %208 = shalt.err (!%p205_p7)
}
  0x11   :  { %s260_s22 = smov 128   ;;  %s261_s23 = smov 8  }
  0x12   :  { %22 = dma.hbm_to_vmem [thread:$0]  %s333_s0, 256, %s17_s13, [#allocation3], %s260_s22, %s260_s22, %s261_s23  }
  0x13   :  { %s262_s26 = smov [#allocation5]   ;;  %s209_s30 = scalar_lea.hbm %s334_s1, 256 }
  0x14   :  { %s28_s27 = sshll.u32 %s262_s26, 4  ;;  %p210_p8 = scmp.ne.s32.totalorder %s334_s1, %s209_s30  ;;  %s29_s27 = int_to_ptr.vmem [resolvable:$true] %s28_s27 }
  0x15   :  { %p213_p9 = scmp.lt.u32.totalorder %s209_s30, %s334_s1 }
  0x17   :  { %p215_p10 = pnand %p213_p9, %p210_p8 }
  0x19   :  { %218 = shalt.err (!%p215_p10)
}
  0x1a   :  { %s219_s8 = scalar_lea.vmem %s29_s27, 256  ;;  %p224_p12 = scmp.lt.s32.totalorder %s29_s27, %s29_s27 }
  0x1b   :  { %p220_p11 = scmp.ne.s32.totalorder %s29_s27, %s219_s8  ;;  %p225_p13 = scmp.lt.s32.totalorder %s219_s8, %s219_s8 }
  0x1d   :  { %p226_p0 = por %p225_p13, %p224_p12 }
  0x1f   :  { %p227_p1 = pnand %p226_p0, %p220_p11 }
  0x21   :  { %230 = shalt.err (!%p227_p1)
}
  0x22   :  { %s263_s0 = smov 64   ;;  %s264_s9 = smov 4  }
  0x23   :  { %34 = dma.hbm_to_vmem [thread:$0]  %s334_s1, 256, %s29_s27, [#allocation6], %s263_s0, %s263_s0, %s264_s9  }
  0x24   :  { %253 = dma.done.wait [#allocation3], 256  }
  0x25   :  { %254 = vsyncadd [#allocation3], 4294967040 }
  0x26   :  { %255 = dma.done.wait [#allocation6], 256  }
  0x27   :  { %256 = vsyncadd [#allocation6], 4294967040  ;;  %v265_v0 = vmov 0.0   ;;  %vm266_vm0 = vmmov 0   ;;  %v177_v1 = vld [vmem:[#allocation5] sm:$0xff]   ;;  %v178_v2 = vld [vmem:[#allocation5 + $0x8] sm:$0xff]  }
  0x28   :  { %160 = vmatprep.subr.bf16.mxu0 %v265_v0  ;;  %164 = vmatprep.mubr.msk.bf16.mxu0 %vm266_vm0, %v265_v0  ;;  %v44_v3 = vld [vmem:[#allocation2] sm:$0xff]  ;;  %v45_v4 = vld [vmem:[#allocation2 + $0x8] sm:$0xff]  ;;  %vm70_vm1 = vcmask 261120  }
  0x29   :  { %161 = vmatpush3.bf16.msra.mxu0 %v177_v1  ;;  %v50_v5 = vpack.c.bf16 %v45_v4, %v44_v3  ;;  %v153_v6 = vld [vmem:[%s335_s2] ss:$0 sm:$0xff]  ;;  %s267_s2 = smov [#allocation7]  }
  0x2a   :  { %162 = vmatprep.subr.bf16.mxu0 %v265_v0  ;;  %s140_s13 = sshll.u32 %s267_s2, 4  ;;  %s141_s13 = int_to_ptr.vmem [resolvable:$true] %s140_s13 }
  0x2b   :  { %s231_s14 = scalar_lea.vmem %s141_s13, 256  ;;  %p236_p3 = scmp.lt.s32.totalorder %s141_s13, %s141_s13 }
  0x2c   :  { %p232_p2 = scmp.ne.s32.totalorder %s141_s13, %s231_s14  ;;  %p237_p4 = scmp.lt.s32.totalorder %s231_s14, %s231_s14 }
  0x2d   :  { %163 = vmatpush3.bf16.msra.mxu0 %v178_v2 }
  0x2e   :  { %p238_p5 = por %p237_p4, %p236_p3 }
  0x30   :  { %165 = vmatmul.mubr.msk.bf16.vlgmr.msra.gmra.mrb[0].mxu0 %vm70_vm1, %v50_v5  ;;  %p239_p6 = pnand %p238_p5, %p232_p2 }
 0x103   :  { %v108_v7 = vpop.f32.mrb[0].mxu0 }
 0x104   :  { %v109_v8 = vadd.f32 %v153_v6, %v108_v7  ;;  %v166_v9 = vpop.f32.mrb[1].mxu0 }
 0x105   :  { %v111_v10 = vpop.f32.mrb[2].mxu0 }
 0x106   :  { %115 = vmax.xlane.f32.xlu0 %v109_v8  ;;  %v167_v11 = vpop.f32.mrb[3].mxu0  ;;  %v112_v12 = vadd.f32 %v153_v6, %v111_v10 }
 0x10a   :  { %117 = vmax.xlane.f32.xlu0 %v112_v12 }
 0x193   :  { %v116_v13 = vpop.xlane.xlu0 %115 }
 0x194   :  { %v119_v14 = vsub.f32 %v109_v8, %v116_v13 }
 0x196   :  { %v121_v15 = vmul.f32 1.442695, %v119_v14 }
 0x197   :  { %v118_v16 = vpop.xlane.xlu0 %117 }
 0x198   :  { %179 = vpow2.f32 %v121_v15  ;;  %v120_v17 = vsub.f32 %v112_v12, %v118_v16 }
 0x19a   :  { %v123_v18 = vmul.f32 1.442695, %v120_v17 }
 0x19c   :  { %181 = vpow2.f32 %v123_v18 }
 0x1a2   :  { %v180_v19 = vpop.eup %179 }
 0x1a3   :  { %125 = vadd.xlane.f32.xlu1 %v180_v19 }
 0x1a6   :  { %v182_v20 = vpop.eup %181 }
 0x1a7   :  { %127 = vadd.xlane.f32.xlu1 %v182_v20 }
 0x230   :  { %v126_v21 = vpop.xlane.xlu1 %125 }
 0x231   :  { %183 = vrcp.f32 %v126_v21 }
 0x234   :  { %v128_v22 = vpop.xlane.xlu1 %127 }
 0x235   :  { %185 = vrcp.f32 %v128_v22 }
 0x23b   :  { %v184_v23 = vpop.eup %183 }
 0x23c   :  { %v130_v24 = vmul.f32 %v184_v23, %v180_v19 }
 0x23e   :  { %133 = vst [vmem:[#allocation7] sm:$0xff] %v130_v24 }
 0x23f   :  { %v186_v25 = vpop.eup %185 }
 0x240   :  { %v132_v26 = vmul.f32 %v186_v25, %v182_v20 }
 0x242   :  { %134 = vst [vmem:[#allocation7 + $0x8] sm:$0xff] %v132_v26 }
 0x243   :  { %242 = shalt.err (!%p239_p6)
}
 0x244   :  { %s243_s17 = scalar_lea.hbm %s336_s3, 256 }
 0x245   :  { %p244_p7 = scmp.ne.s32.totalorder %s336_s3, %s243_s17  ;;  %p247_p8 = scmp.lt.u32.totalorder %s243_s17, %s336_s3 }
 0x247   :  { %p249_p9 = pnand %p247_p8, %p244_p7 }
 0x249   :  { %252 = shalt.err (!%p249_p9)
}
 0x24a   :  { %146 = dma.vmem_to_hbm [thread:$0]  %s141_s13, 256, %s336_s3, [#allocation4], %s260_s22, %s260_s22, %s261_s23  }
 0x24b   :  { %257 = dma.done.wait [#allocation4], 256  }
 0x24c   :  { %258 = vsyncadd [#allocation4], 4294967040 }
 0x24d   :  { %150 = vsyncpa [#allocation3], 1 }
 0x24e   :  { %151 = vsyncpa [#allocation6], 1 }
 0x24f   :  { %152 = vsyncpa [#allocation4], 1 }

</bundles_post_ra>
